<compile_context>
chip_gen: v7x
topology: tpu7x:2x2x1
jax: 0.10.0
libtpu: 0.0.40
codegen_flags: <defaults>
</compile_context>

<pallas_src>
import math

import jax
import jax.numpy as jnp
from jax.experimental import pallas as pl
from jax.experimental.pallas import tpu as pltpu


def _round_up(x, m):
    return ((x + m - 1) // m) * m


_VMEM_LIMIT = 64 * 1024 * 1024  # <= physical VMEM on v5e/v6e/v7x; usage is far below this


# ----------------------------------------------------------------------------
# Kernel 1: token-tiled linear projection  y = x @ Wt + b
#   Wt is pre-transposed (Din, Dout) and stored bf16 (MXU operand dtype);
#   bias and accumulation stay f32.
# ----------------------------------------------------------------------------
def _linear_kernel(x_ref, wt_ref, b_ref, o_ref):
    x = x_ref[...].astype(wt_ref.dtype)                      # bf16 MXU operand
    acc = jnp.dot(x, wt_ref[...], preferred_element_type=jnp.float32)
    o_ref[...] = (acc + b_ref[...]).astype(o_ref.dtype)


def linear(x, wt, b, *, tm=512):
    """x: (..., Din); wt: (Din, Dout) pre-transposed (bf16) weight; b: (Dout,) f32."""
    lead = x.shape[:-1]
    din = x.shape[-1]
    dout = wt.shape[1]
    x2 = x.reshape(-1, din)
    m = x2.shape[0]

    tm_eff = min(tm, _round_up(m, 8))          # multiple of 8 sublanes
    m_pad = _round_up(m, tm_eff)
    if m_pad != m:
        x2 = jnp.pad(x2, ((0, m_pad - m), (0, 0)))

    out = pl.pallas_call(
        _linear_kernel,
        out_shape=jax.ShapeDtypeStruct((m_pad, dout), x.dtype),
        grid_spec=pltpu.PrefetchScalarGridSpec(
            num_scalar_prefetch=0,
            grid=(m_pad // tm_eff,),
            in_specs=[
                pl.BlockSpec((tm_eff, din), lambda i: (i, 0)),   # token tile
                pl.BlockSpec((din, dout), lambda i: (0, 0)),     # weight resident
                pl.BlockSpec((1, dout), lambda i: (0, 0)),       # bias resident
            ],
            out_specs=pl.BlockSpec((tm_eff, dout), lambda i: (i, 0)),
        ),
        compiler_params=pltpu.CompilerParams(
            dimension_semantics=("parallel",),
            vmem_limit_bytes=_VMEM_LIMIT),
    )(x2, wt, b.reshape(1, dout))

    if m_pad != m:
        out = out[:m]
    return out.reshape(*lead, dout)


# ----------------------------------------------------------------------------
# Kernel 2: flash-style multi-head SDPA, heads fused in the channel dim.
#   q/k/v/out blocks are (TQ|TK, H*hd): lane-dense I/O; per-head slices in-kernel.
#   q is assumed pre-scaled by 1/sqrt(hd) (folded into the q projection).
# ----------------------------------------------------------------------------
def _make_flash_kernel(num_heads, head_dim, nk_valid, tk, mask_k, mxu_dtype):
    def kernel(q_ref, k_ref, v_ref, o_ref, m_scr, l_scr, acc_scr):
        # q_ref: (TQ, C)  k_ref/v_ref: (TK, C)  o_ref: (TQ, C)     (C = H*hd)
        # m_scr/l_scr: (H, TQ, 1) f32   acc_scr: (H, TQ, hd) f32
        ki = pl.program_id(2)

        @pl.when(ki == 0)
        def _():
            m_scr[...] = jnp.full(m_scr.shape, -jnp.inf, m_scr.dtype)
            l_scr[...] = jnp.zeros(l_scr.shape, l_scr.dtype)
            acc_scr[...] = jnp.zeros(acc_scr.shape, acc_scr.dtype)

        q = q_ref[...].astype(mxu_dtype)     # already scaled by 1/sqrt(hd)
        k = k_ref[...].astype(mxu_dtype)
        v = v_ref[...].astype(mxu_dtype)

        if mask_k:
            # Additive key-padding bias, computed once per grid step on a (1, TK) row.
            # It is exactly zero on every KV tile except the padded last one.
            col = jax.lax.broadcasted_iota(jnp.int32, (1, tk), 1) + ki * tk
            kbias = jnp.where(col < nk_valid, 0.0, -jnp.inf).astype(jnp.float32)

        for h in range(num_heads):
            sl = slice(h * head_dim, (h + 1) * head_dim)
            qh = q[:, sl]                    # (TQ, hd)
            kh = k[:, sl]                    # (TK, hd)
            vh = v[:, sl]                    # (TK, hd)

            # scores: contract head_dim -> (TQ, TK), f32 accumulation on the MXU
            s = jax.lax.dot_general(
                qh, kh, dimension_numbers=(((1,), (1,)), ((), ())),
                preferred_element_type=jnp.float32)
            if mask_k:
                s = s + kbias

            m_prev = m_scr[h]
            m_new = jnp.maximum(m_prev, jnp.max(s, axis=-1, keepdims=True))
            alpha = jnp.exp(m_prev - m_new)
            p = jnp.exp(s - m_new)
            l_scr[h] = alpha * l_scr[h] + jnp.sum(p, axis=-1, keepdims=True)
            acc_scr[h] = alpha * acc_scr[h] + jnp.dot(
                p.astype(mxu_dtype), vh, preferred_element_type=jnp.float32)
            m_scr[h] = m_new

        @pl.when(ki == pl.num_programs(2) - 1)
        def _():
            # Deferred normalization; reciprocal runs on the EUP slot.
            for h in range(num_heads):
                inv_l = pl.reciprocal(l_scr[h], approx=True)
                o_ref[:, h * head_dim:(h + 1) * head_dim] = (
                    acc_scr[h] * inv_l).astype(o_ref.dtype)

    return kernel


def sdpa(q, k, v, num_heads, *, tq=256, tk=512, mxu_dtype=jnp.bfloat16):
    """q: (B, Nq, C) pre-scaled by 1/sqrt(C//num_heads); k/v: (B, Nk, C) -> (B, Nq, C)."""
    B, Nq, C = q.shape
    Nk = k.shape[1]
    assert C % num_heads == 0
    hd = C // num_heads

    tq_eff = min(tq, _round_up(Nq, 8))
    tk_eff = min(tk, _round_up(Nk, 8))
    nq_pad = _round_up(Nq, tq_eff)
    nk_pad = _round_up(Nk, tk_eff)
    if nq_pad != Nq:
        q = jnp.pad(q, ((0, 0), (0, nq_pad - Nq), (0, 0)))
    if nk_pad != Nk:
        k = jnp.pad(k, ((0, 0), (0, nk_pad - Nk), (0, 0)))
        v = jnp.pad(v, ((0, 0), (0, nk_pad - Nk), (0, 0)))
    mask_k = nk_pad != Nk

    out = pl.pallas_call(
        _make_flash_kernel(num_heads, hd, Nk, tk_eff, mask_k, mxu_dtype),
        out_shape=jax.ShapeDtypeStruct((B, nq_pad, C), q.dtype),
        grid_spec=pltpu.PrefetchScalarGridSpec(
            num_scalar_prefetch=0,
            grid=(B, nq_pad // tq_eff, nk_pad // tk_eff),
            in_specs=[
                pl.BlockSpec((None, tq_eff, C), lambda b, qi, ki: (b, qi, 0)),
                pl.BlockSpec((None, tk_eff, C), lambda b, qi, ki: (b, ki, 0)),
                pl.BlockSpec((None, tk_eff, C), lambda b, qi, ki: (b, ki, 0)),
            ],
            out_specs=pl.BlockSpec((None, tq_eff, C), lambda b, qi, ki: (b, qi, 0)),
            scratch_shapes=[
                pltpu.VMEM((num_heads, tq_eff, 1), jnp.float32),   # running max
                pltpu.VMEM((num_heads, tq_eff, 1), jnp.float32),   # running denominator
                pltpu.VMEM((num_heads, tq_eff, hd), jnp.float32),  # output accumulator
            ],
        ),
        compiler_params=pltpu.CompilerParams(
            dimension_semantics=("parallel", "parallel", "arbitrary"),
            vmem_limit_bytes=_VMEM_LIMIT),
    )(q, k, v)

    if nq_pad != Nq:
        out = out[:, :Nq, :]
    return out


# ----------------------------------------------------------------------------
# Attention module (eval mode: dropout_p = 0)
# ----------------------------------------------------------------------------
class AttentionParams:
    def __init__(self, key, embedding_dim, num_heads, downsample_rate=1,
                 kv_in_dim=None, dtype=jnp.float32):
        self.embedding_dim = embedding_dim
        self.kv_in_dim = kv_in_dim if kv_in_dim is not None else embedding_dim
        self.internal_dim = embedding_dim // downsample_rate
        self.num_heads = num_heads
        assert self.internal_dim % num_heads == 0
        head_dim = self.internal_dim // num_heads
        scale = 1.0 / math.sqrt(head_dim)

        ks = jax.random.split(key, 8)

        def lin(kw, kb, fan_in, fan_out):
            bound = 1.0 / math.sqrt(fan_in)
            w = jax.random.uniform(kw, (fan_out, fan_in), dtype, -bound, bound)
            b = jax.random.uniform(kb, (fan_out,), dtype, -bound, bound)
            # store pre-transposed (fan_in, fan_out)
            return jnp.asarray(w.T), b

        # Raw f32 parameters (used by the pure-JAX reference).
        self.q_wt, self.q_b = lin(ks[0], ks[1], embedding_dim, self.internal_dim)
        self.k_wt, self.k_b = lin(ks[2], ks[3], self.kv_in_dim, self.internal_dim)
        self.v_wt, self.v_b = lin(ks[4], ks[5], self.kv_in_dim, self.internal_dim)
        self.o_wt, self.o_b = lin(ks[6], ks[7], self.internal_dim, embedding_dim)

        # Kernel compute copies: softmax scale folded into the q projection at init,
        # weights cast once to bf16 (MXU operand dtype); biases stay f32.
        mxu = jnp.bfloat16
        self.q_wt_c = (self.q_wt * scale).astype(mxu)
        self.q_b_c = self.q_b * scale
        self.k_wt_c = self.k_wt.astype(mxu)
        self.k_b_c = self.k_b
        self.v_wt_c = self.v_wt.astype(mxu)
        self.v_b_c = self.v_b
        self.o_wt_c = self.o_wt.astype(mxu)
        self.o_b_c = self.o_b


def attention_forward(params, q, k, v):
    # TODO(synk): dropout (training mode) has no kernel here; eval forward only.
    qp = linear(q, params.q_wt_c, params.q_b_c)   # (B, Nq, internal), pre-scaled
    kp = linear(k, params.k_wt_c, params.k_b_c)   # (B, Nk, internal)
    vp = linear(v, params.v_wt_c, params.v_b_c)   # (B, Nk, internal)
    # Heads stay fused in the channel dim -> no XLA transposes between kernels.
    o = sdpa(qp, kp, vp, params.num_heads)        # (B, Nq, internal)
    return linear(o, params.o_wt_c, params.o_b_c)  # (B, Nq, embedding_dim)


# Pure-JAX reference (faithful to the PyTorch module, f32 weights).
def attention_ref(params, q, k, v):
    B, Nq, _ = q.shape
    Nk = k.shape[1]
    H = params.num_heads
    hd = params.internal_dim // H

    def lin(x, wt, b):
        return x @ wt + b

    qh = lin(q, params.q_wt, params.q_b).reshape(B, Nq, H, hd).transpose(0, 2, 1, 3)
    kh = lin(k, params.k_wt, params.k_b).reshape(B, Nk, H, hd).transpose(0, 2, 1, 3)
    vh = lin(v, params.v_wt, params.v_b).reshape(B, Nk, H, hd).transpose(0, 2, 1, 3)
    s = jnp.einsum("bhqd,bhkd->bhqk", qh, kh) / math.sqrt(hd)
    p = jax.nn.softmax(s, axis=-1)
    oh = jnp.einsum("bhqk,bhkd->bhqd", p, vh)
    o = oh.transpose(0, 2, 1, 3).reshape(B, Nq, params.internal_dim)
    return lin(o, params.o_wt, params.o_b)


def _sdpa_ref(q, k, v, num_heads):
    B, Nq, C = q.shape
    Nk = k.shape[1]
    hd = C // num_heads
    qh = q.reshape(B, Nq, num_heads, hd).transpose(0, 2, 1, 3)
    kh = k.reshape(B, Nk, num_heads, hd).transpose(0, 2, 1, 3)
    vh = v.reshape(B, Nk, num_heads, hd).transpose(0, 2, 1, 3)
    s = jnp.einsum("bhqd,bhkd->bhqk", qh, kh) / math.sqrt(hd)
    p = jax.nn.softmax(s, axis=-1)
    oh = jnp.einsum("bhqk,bhkd->bhqd", p, vh)
    return oh.transpose(0, 2, 1, 3).reshape(B, Nq, C)


if __name__ == "__main__":
    key = jax.random.PRNGKey(0)
    kp, kq, kk, kv = jax.random.split(key, 4)

    embedding_dim, num_heads, downsample_rate = 32, 4, 1
    params = AttentionParams(kp, embedding_dim, num_heads, downsample_rate)

    # --- 1) small smoke test ---
    B, Nq, Nk = 2, 8, 8
    q = jax.random.normal(kq, (B, Nq, embedding_dim), jnp.float32)
    k = jax.random.normal(kk, (B, Nk, embedding_dim), jnp.float32)
    v = jax.random.normal(kv, (B, Nk, embedding_dim), jnp.float32)

    out = jax.block_until_ready(attention_forward(params, q, k, v))
    ref = attention_ref(params, q, k, v)
    assert out.shape == (B, Nq, embedding_dim)
    assert jnp.allclose(out, ref, atol=2e-2, rtol=2e-2), \
        float(jnp.max(jnp.abs(out - ref)))

    # --- 2) ragged sequence lengths (padded / masked flash path, single KV tile) ---
    B2, Nq2, Nk2 = 1, 200, 150
    kq2, kk2, kv2 = jax.random.split(jax.random.PRNGKey(1), 3)
    q2 = jax.random.normal(kq2, (B2, Nq2, embedding_dim), jnp.float32)
    k2 = jax.random.normal(kk2, (B2, Nk2, embedding_dim), jnp.float32)
    v2 = jax.random.normal(kv2, (B2, Nk2, embedding_dim), jnp.float32)

    out2 = jax.block_until_ready(attention_forward(params, q2, k2, v2))
    ref2 = attention_ref(params, q2, k2, v2)
    assert out2.shape == (B2, Nq2, embedding_dim)
    assert jnp.allclose(out2, ref2, atol=2e-2, rtol=2e-2), \
        float(jnp.max(jnp.abs(out2 - ref2)))

    # --- 3) direct flash-SDPA test: multiple KV tiles + padded last tile ---
    B3, Nq3, Nk3, C3, H3 = 1, 320, 312, 32, 4
    hd3 = C3 // H3
    kq3, kk3, kv3 = jax.random.split(jax.random.PRNGKey(2), 3)
    q3 = jax.random.normal(kq3, (B3, Nq3, C3), jnp.float32)
    k3 = jax.random.normal(kk3, (B3, Nk3, C3), jnp.float32)
    v3 = jax.random.normal(kv3, (B3, Nk3, C3), jnp.float32)

    out3 = jax.block_until_ready(
        sdpa(q3 * (1.0 / math.sqrt(hd3)), k3, v3, H3, tq=64, tk=64))
    ref3 = _sdpa_ref(q3, k3, v3, H3)
    assert out3.shape == (B3, Nq3, C3)
    assert jnp.allclose(out3, ref3, atol=2e-2, rtol=2e-2), \
        float(jnp.max(jnp.abs(out3 - ref3)))

    print("KERNEL_OK")
</pallas_src>

<mosaic_0001>
module attributes {stable_mosaic.version = 11 : i64} {
  func.func @_linear_kernel(%arg0: i32, %arg1: memref<16x32xf32, #tpu.memory_space<vmem>>, %arg2: memref<32x32xbf16, #tpu.memory_space<vmem>>, %arg3: memref<1x32xf32, #tpu.memory_space<vmem>>, %arg4: memref<16x32xf32, #tpu.memory_space<vmem>>) attributes {dimension_semantics = [#tpu.dimension_semantics<parallel>], iteration_bounds = array<i64: 1>, scalar_prefetch = 0 : i64, scratch_operands = 0 : i64, tpu.core_type = #tpu.core_type<tc>, window_params = [{transform_indices = @transform_0, window_bounds = array<i64: 16, 32>}, {pipeline_mode = #tpu.pipeline_mode<synchronous>, transform_indices = @transform_1, window_bounds = array<i64: 32, 32>}, {pipeline_mode = #tpu.pipeline_mode<synchronous>, transform_indices = @transform_2, window_bounds = array<i64: 1, 32>}, {transform_indices = @transform_3, window_bounds = array<i64: 16, 32>}]} {
    %c0 = arith.constant 0 : index
    %c0_0 = arith.constant 0 : index
    %0 = vector.load %arg1[%c0, %c0_0] : memref<16x32xf32, #tpu.memory_space<vmem>>, vector<16x32xf32>
    %1 = arith.truncf %0 : vector<16x32xf32> to vector<16x32xbf16>
    %c0_1 = arith.constant 0 : index
    %c0_2 = arith.constant 0 : index
    %2 = vector.load %arg2[%c0_1, %c0_2] : memref<32x32xbf16, #tpu.memory_space<vmem>>, vector<32x32xbf16>
    %cst = arith.constant dense<0.000000e+00> : vector<16x32xf32>
    %3 = tpu.matmul %1, %2, %cst {dimension_numbers = #tpu.dot_dimension_numbers<[1], [0], [0], [1], [0, 0, 1, 1], [], []>} : vector<16x32xbf16>, vector<32x32xbf16>, vector<16x32xf32> -> vector<16x32xf32>
    %c0_3 = arith.constant 0 : index
    %c0_4 = arith.constant 0 : index
    %4 = vector.load %arg3[%c0_3, %c0_4] : memref<1x32xf32, #tpu.memory_space<vmem>>, vector<1x32xf32>
    %5 = vector.broadcast %4 : vector<1x32xf32> to vector<16x32xf32>
    %6 = arith.addf %3, %5 : vector<16x32xf32>
    %c0_5 = arith.constant 0 : index
    %c0_6 = arith.constant 0 : index
    %7 = vector.load %arg4[%c0_5, %c0_6] : memref<16x32xf32, #tpu.memory_space<vmem>>, vector<16x32xf32>
    tpu.vector_store %arg4[%c0_5, %c0_6], %6 {strides = array<i32>} : memref<16x32xf32, #tpu.memory_space<vmem>>, vector<16x32xf32>,
    return
  }
  func.func @transform_0(%arg0: i32) -> (i32, i32) {
    %c0_i32 = arith.constant 0 : i32
    %c0_i32_0 = arith.constant 0 : i32
    return %arg0, %c0_i32 : i32, i32
  }
  func.func @transform_1(%arg0: i32) -> (i32, i32) {
    %c0_i32 = arith.constant 0 : i32
    %c0_i32_0 = arith.constant 0 : i32
    %c0_i32_1 = arith.constant 0 : i32
    return %c0_i32, %c0_i32_0 : i32, i32
  }
  func.func @transform_2(%arg0: i32) -> (i32, i32) {
    %c0_i32 = arith.constant 0 : i32
    %c0_i32_0 = arith.constant 0 : i32
    %c0_i32_1 = arith.constant 0 : i32
    return %c0_i32, %c0_i32_0 : i32, i32
  }
  func.func @transform_3(%arg0: i32) -> (i32, i32) {
    %c0_i32 = arith.constant 0 : i32
    %c0_i32_0 = arith.constant 0 : i32
    return %arg0, %c0_i32 : i32, i32
  }
}

</mosaic_0001>

<bundles_post_ra>
// kernel: tpu_custom_call.1
= control target key start
LH: loop header
LB: loop body
LE: loop exit
PB: predicated region body
PF: predicated region fallthrough
CT: control target
= control target key end

     0   :  { %8 = vsyncpa [#allocation3], 0  ;;  %s351_s0 = inlined_call_operand.hbm [shape: f32[16,32], index: 0, kind: input, shape index: {}]   ;;  %s352_s1 = inlined_call_operand.hbm [shape: bf16[32,32], index: 1, kind: input, shape index: {}]   ;;  %s353_s2 = inlined_call_operand.hbm [shape: f32[1,32], index: 2, kind: input, shape index: {}]   ;;  %s354_s3 = inlined_call_operand.hbm [shape: f32[16,32], index: 3, kind: output, shape index: {}]  }
   0x1   :  { %9 = vsyncpa [#allocation6], 0 }
   0x2   :  { %10 = vsyncpa [#allocation4], 0  ;;  %s267_s12 = smov [#allocation5]   ;;  %s173_s16 = scalar_lea.hbm %s352_s1, 256 }
   0x3   :  { %s28_s13 = sshll.u32 %s267_s12, 4  ;;  %p174_p0 = scmp.ne.s32.totalorder %s352_s1, %s173_s16  ;;  %s29_s13 = int_to_ptr.vmem [resolvable:$true] %s28_s13 }
   0x4   :  { %p177_p1 = scmp.lt.u32.totalorder %s173_s16, %s352_s1 }
   0x6   :  { %p179_p2 = pnand %p177_p1, %p174_p0 }
   0x8   :  { %182 = shalt.err (!%p179_p2)
}
   0x9   :  { %s183_s21 = scalar_lea.vmem %s29_s13, 256  ;;  %p188_p4 = scmp.lt.s32.totalorder %s29_s13, %s29_s13 }
   0xa   :  { %p184_p3 = scmp.ne.s32.totalorder %s29_s13, %s183_s21  ;;  %p189_p5 = scmp.lt.s32.totalorder %s183_s21, %s183_s21 }
   0xc   :  { %p190_p6 = por %p189_p5, %p188_p4 }
   0xe   :  { %p191_p7 = pnand %p190_p6, %p184_p3 }
  0x10   :  { %194 = shalt.err (!%p191_p7)
}
  0x11   :  { %s268_s22 = smov 64   ;;  %s269_s23 = smov 4  }
  0x12   :  { %34 = dma.hbm_to_vmem [thread:$0]  %s352_s1, 256, %s29_s13, [#allocation6], %s268_s22, %s268_s22, %s269_s23  }
  0x13   :  { %s270_s26 = smov [#allocation2]   ;;  %s195_s30 = scalar_lea.hbm %s351_s0, 256 }
  0x14   :  { %s16_s27 = sshll.u32 %s270_s26, 4  ;;  %p196_p8 = scmp.ne.s32.totalorder %s351_s0, %s195_s30  ;;  %s17_s27 = int_to_ptr.vmem [resolvable:$true] %s16_s27 }
  0x15   :  { %p199_p9 = scmp.lt.u32.totalorder %s195_s30, %s351_s0 }
  0x17   :  { %p201_p10 = pnand %p199_p9, %p196_p8 }
  0x19   :  { %204 = shalt.err (!%p201_p10)
}
  0x1a   :  { %s205_s8 = scalar_lea.vmem %s17_s27, 256  ;;  %p210_p12 = scmp.lt.s32.totalorder %s17_s27, %s17_s27 }
  0x1b   :  { %p206_p11 = scmp.ne.s32.totalorder %s17_s27, %s205_s8  ;;  %p211_p13 = scmp.lt.s32.totalorder %s205_s8, %s205_s8 }
  0x1d   :  { %p212_p0 = por %p211_p13, %p210_p12 }
  0x1f   :  { %p213_p1 = pnand %p212_p0, %p206_p11 }
  0x21   :  { %216 = shalt.err (!%p213_p1)
}
  0x22   :  { %s271_s1 = smov 128   ;;  %s272_s9 = smov 8  }
  0x23   :  { %22 = dma.hbm_to_vmem [thread:$0]  %s351_s0, 256, %s17_s27, [#allocation3], %s271_s1, %s271_s1, %s272_s9  }
  0x24   :  { %s273_s12 = smov [#allocation7]   ;;  %s217_s16 = scalar_lea.hbm %s353_s2, 16 }
  0x25   :  { %s41_s13 = sshll.u32 %s273_s12, 4  ;;  %p218_p2 = scmp.ne.s32.totalorder %s353_s2, %s217_s16  ;;  %s42_s13 = int_to_ptr.vmem [resolvable:$true] %s41_s13 }
  0x26   :  { %p221_p3 = scmp.lt.u32.totalorder %s217_s16, %s353_s2 }
  0x28   :  { %p223_p4 = pnand %p221_p3, %p218_p2 }
  0x2a   :  { %226 = shalt.err (!%p223_p4)
}
  0x2b   :  { %s227_s21 = scalar_lea.vmem %s42_s13, 16  ;;  %s231_s0 = scalar_lea.vmem %s42_s13, 32 }
  0x2c   :  { %p228_p5 = scmp.ne.s32.totalorder %s42_s13, %s227_s21  ;;  %p232_p6 = scmp.lt.s32.totalorder %s42_s13, %s42_s13 }
  0x2d   :  { %p233_p7 = scmp.lt.s32.totalorder %s231_s0, %s227_s21 }
  0x2f   :  { %p234_p8 = por %p233_p7, %p232_p6 }
  0x31   :  { %p235_p9 = pnand %p234_p8, %p228_p5 }
  0x33   :  { %238 = shalt.err (!%p235_p9)
}
  0x34   :  { %44 = dma.hbm_to_vmem [thread:$0]  %s353_s2, 16, %s42_s13, [#allocation6]  }
  0x35   :  { %261 = dma.done.wait [#allocation3], 256  }
  0x36   :  { %262 = vsyncadd [#allocation3], 4294967040 }
  0x37   :  { %263 = dma.done.wait [#allocation6], 272  }
  0x38   :  { %264 = vsyncadd [#allocation6], 4294967024  ;;  %v274_v0 = vmov 0.0   ;;  %vm275_vm0 = vmmov 0   ;;  %v171_v1 = vld [vmem:[#allocation5] sm:$0xff]   ;;  %v172_v2 = vld [vmem:[#allocation5 + $0x8] sm:$0xff]  }
  0x39   :  { %153 = vmatprep.subr.bf16.mxu0 %v274_v0  ;;  %157 = vmatprep.mubr.msk.bf16.mxu0 %vm275_vm0, %v274_v0  ;;  %v55_v3 = vld [vmem:[#allocation2] sm:$0xff]  ;;  %v56_v4 = vld [vmem:[#allocation2 + $0x8] sm:$0xff]  ;;  %vm81_vm1 = vcmask 261120   ;;  %s276_s2 = smov [#allocation8]  }
  0x3a   :  { %154 = vmatpush3.bf16.msra.mxu0 %v171_v1  ;;  %v57_v5 = vpack.c.bf16 %v56_v4, %v55_v3  ;;  %v146_v6 = vld [vmem:[#allocation7] ss:$0 sm:$0xff]  ;;  %s133_s24 = sshll.u32 %s276_s2, 4  ;;  %s134_s24 = int_to_ptr.vmem [resolvable:$true] %s133_s24 }
  0x3b   :  { %155 = vmatprep.subr.bf16.mxu0 %v274_v0  ;;  %s239_s25 = scalar_lea.vmem %s134_s24, 256  ;;  %p244_p11 = scmp.lt.s32.totalorder %s134_s24, %s134_s24 }
  0x3c   :  { %p240_p10 = scmp.ne.s32.totalorder %s134_s24, %s239_s25  ;;  %p245_p12 = scmp.lt.s32.totalorder %s239_s25, %s239_s25 }
  0x3e   :  { %156 = vmatpush3.bf16.msra.mxu0 %v172_v2  ;;  %p246_p13 = por %p245_p12, %p244_p11 }
  0x40   :  { %p247_p0 = pnand %p246_p13, %p240_p10 }
  0x41   :  { %158 = vmatmul.mubr.msk.bf16.vlgmr.msra.gmra.mrb[0].mxu0 %vm81_vm1, %v57_v5 }
 0x114   :  { %v119_v7 = vpop.f32.mrb[0].mxu0 }
 0x115   :  { %v120_v8 = vadd.f32 %v146_v6, %v119_v7  ;;  %v159_v9 = vpop.f32.mrb[1].mxu0 }
 0x116   :  { %v122_v10 = vpop.f32.mrb[2].mxu0 }
 0x117   :  { %126 = vst.msk [vmem:[#allocation8] sm:$0xff] %vm81_vm1, %v120_v8  ;;  %v123_v11 = vadd.f32 %v146_v6, %v122_v10  ;;  %v160_v12 = vpop.f32.mrb[3].mxu0 }
 0x119   :  { %127 = vst.msk [vmem:[#allocation8 + $0x8] sm:$0xff] %vm81_vm1, %v123_v11 }
 0x11a   :  { %250 = shalt.err (!%p247_p0)
}
 0x11b   :  { %s251_s28 = scalar_lea.hbm %s354_s3, 256 }
 0x11c   :  { %p252_p1 = scmp.ne.s32.totalorder %s354_s3, %s251_s28  ;;  %p255_p2 = scmp.lt.u32.totalorder %s251_s28, %s354_s3 }
 0x11e   :  { %p257_p3 = pnand %p255_p2, %p252_p1 }
 0x120   :  { %260 = shalt.err (!%p257_p3)
}
 0x121   :  { %139 = dma.vmem_to_hbm [thread:$0]  %s134_s24, 256, %s354_s3, [#allocation4], %s271_s1, %s271_s1, %s272_s9  }
 0x122   :  { %265 = dma.done.wait [#allocation4], 256  }
 0x123   :  { %266 = vsyncadd [#allocation4], 4294967040 }
 0x124   :  { %143 = vsyncpa [#allocation3], 1 }
 0x125   :  { %144 = vsyncpa [#allocation6], 1 }
 0x126   :  { %145 = vsyncpa [#allocation4], 1 }

</bundles_post_ra>
